<compile_context>
chip_gen: v7x
topology: tpu7x:2x2x1
jax: 0.10.0
libtpu: 0.0.40
codegen_flags: <defaults>
</compile_context>

<pallas_src>
import functools

import jax
import jax.numpy as jnp
from jax.experimental import pallas as pl
from jax.experimental.pallas import tpu as pltpu


def _round_up(x, m):
    return (x + m - 1) // m * m


_INV_SQRT2 = 0.7071067811865476


def _gelu_exact_f32(x):
    # nn.GELU() default is the exact (erf-based) GELU; keep activation math in
    # f32 for parity (and v5e has no bf16 VPU/EUP path anyway).
    return 0.5 * x * (1.0 + jax.lax.erf(x * _INV_SQRT2))


def _mlp_kernel(x_ref, w1_ref, b1_ref, w2_ref, b2_ref, o_ref, *, n_chunks, thc):
    # grid = (row tiles,). Weights are fully VMEM-resident (constant block
    # index -> fetched from HBM exactly once per pallas_call). The hidden dim
    # is chunked inside the kernel only to bound the (tm, thc) f32
    # intermediate; chunk slices are static -> zero runtime cost.
    # x_ref : (tm, D_in_p)        row tile
    # w1_ref: (D_in_p, H_p)       full fc1 weight
    # b1_ref: (1, H_p)            full fc1 bias
    # w2_ref: (H_p, D_out_p)      full fc2 weight
    # b2_ref: (1, D_out_p)        full fc2 bias
    # o_ref : (tm, D_out_p)       output tile
    x = x_ref[...]
    acc = None
    for c in range(n_chunks):  # static unroll
        lo = c * thc
        # fc1 slice: native-dtype operands on the MXU, f32 accumulate.
        h = jnp.dot(x, w1_ref[:, lo:lo + thc],
                    preferred_element_type=jnp.float32)
        h = _gelu_exact_f32(h + b1_ref[:, lo:lo + thc].astype(jnp.float32))
        # fc2 slice, accumulated in f32.
        p = jnp.dot(h.astype(w2_ref.dtype), w2_ref[lo:lo + thc, :],
                    preferred_element_type=jnp.float32)
        acc = p if acc is None else acc + p
    o_ref[...] = (acc + b2_ref[...].astype(jnp.float32)).astype(o_ref.dtype)


def mlp_forward(x, w1, b1, w2, b2, *, tm=256, hidden_chunk=None):
    """x: (B, N, D_in). w1: (D_in, H), b1: (H,), w2: (H, D_out), b2: (D_out,).

    Returns (B, N, D_out). Dropout p=0 (eval / default) is the identity.
    `hidden_chunk` optionally forces the in-kernel hidden chunk size.
    """
    B, N, D_in = x.shape
    d_in_w, H = w1.shape
    h_w, D_out = w2.shape
    assert d_in_w == D_in and h_w == H

    M = B * N

    # --- feature padding (zero padding is exact: gelu(0+0)=0 contributes
    #     nothing through zero-padded W2 rows / columns) ---
    d_in_p = _round_up(D_in, 128)
    d_out_p = _round_up(D_out, 256)   # full-width MXU passes on v6e/v7x

    # Row tile: multiple of 16 (bf16 sublane packing); for small batches make
    # sure we still get >= 2 row tiles so both v7x TensorCores have work.
    tm = max(16, min(tm, _round_up((M + 1) // 2, 16)))
    m_p = _round_up(M, tm)

    # Hidden padding + in-kernel chunk size. Prefer a single chunk; chunk only
    # to bound the (tm, thc) f32 intermediate (<= 4 MiB). Never shrink below
    # 256 and never pad H beyond the next 256 multiple.
    if hidden_chunk is not None:
        thc = max(128, _round_up(hidden_chunk, 128))
        h_p = _round_up(H, thc)
    else:
        h_p = _round_up(H, 256)
        thc = 256
        for cand in range(h_p, 0, -256):
            if h_p % cand == 0 and tm * cand * 4 <= (4 << 20):
                thc = cand
                break
    n_chunks = h_p // thc

    # --- pad only when needed (skip extra HBM passes for aligned dims) ---
    x2d = x.reshape(M, D_in)
    if (m_p, d_in_p) != (M, D_in):
        x2d = jnp.pad(x2d, ((0, m_p - M), (0, d_in_p - D_in)))
    w1_p = w1 if (d_in_p, h_p) == (D_in, H) else jnp.pad(
        w1, ((0, d_in_p - D_in), (0, h_p - H)))
    b1_p = b1.reshape(1, H)
    if h_p != H:
        b1_p = jnp.pad(b1_p, ((0, 0), (0, h_p - H)))
    w2_p = w2 if (h_p, d_out_p) == (H, D_out) else jnp.pad(
        w2, ((0, h_p - H), (0, d_out_p - D_out)))
    b2_p = b2.reshape(1, D_out)
    if d_out_p != D_out:
        b2_p = jnp.pad(b2_p, ((0, 0), (0, d_out_p - D_out)))

    isz_x = jnp.dtype(x.dtype).itemsize
    isz_w = jnp.dtype(w1.dtype).itemsize

    # --- VMEM budget: resident weights (x2 for default double buffering),
    #     double-buffered x/out row tiles, f32 intermediates. Cap at 48 MiB
    #     (v7x TensorCore has only 64 MiB physical VMEM). ---
    weight_bytes = ((d_in_p * h_p + h_p * d_out_p) + (h_p + d_out_p)) * isz_w
    act_tile_bytes = tm * (d_in_p + d_out_p) * isz_x
    inter_bytes = tm * thc * 4 + tm * d_out_p * 4
    vmem_bytes = 2 * weight_bytes + 2 * act_tile_bytes + inter_bytes + (4 << 20)
    vmem_bytes = int(min(max(vmem_bytes, 16 << 20), 48 << 20))

    cost = pl.CostEstimate(
        flops=2 * m_p * (d_in_p * h_p + h_p * d_out_p),
        transcendentals=m_p * h_p,
        bytes_accessed=int(x2d.size * isz_x
                           + (w1_p.size + w2_p.size + b1_p.size + b2_p.size) * isz_w
                           + m_p * d_out_p * isz_x),
    )

    kernel = functools.partial(_mlp_kernel, n_chunks=n_chunks, thc=thc)

    out2d = pl.pallas_call(
        kernel,
        out_shape=jax.ShapeDtypeStruct((m_p, d_out_p), x.dtype),
        grid_spec=pltpu.PrefetchScalarGridSpec(
            num_scalar_prefetch=0,
            grid=(m_p // tm,),
            in_specs=[
                pl.BlockSpec((tm, d_in_p), lambda i: (i, 0)),     # x row tile
                pl.BlockSpec((d_in_p, h_p), lambda i: (0, 0)),    # W1 (resident)
                pl.BlockSpec((1, h_p), lambda i: (0, 0)),         # b1 (resident)
                pl.BlockSpec((h_p, d_out_p), lambda i: (0, 0)),   # W2 (resident)
                pl.BlockSpec((1, d_out_p), lambda i: (0, 0)),     # b2 (resident)
            ],
            out_specs=pl.BlockSpec((tm, d_out_p), lambda i: (i, 0)),
        ),
        compiler_params=pltpu.CompilerParams(
            dimension_semantics=("parallel",),
            vmem_limit_bytes=vmem_bytes,
        ),
        cost_estimate=cost,
    )(x2d, w1_p, b1_p, w2_p, b2_p)

    if (m_p, d_out_p) != (M, D_out):
        out2d = out2d[:M, :D_out]
    return out2d.reshape(B, N, D_out)


def init_mlp_params(key, in_features, hidden_features, out_features, dtype=jnp.float32):
    """nn.Linear-style uniform(+/- 1/sqrt(fan_in)) init; weights stored
    transposed vs PyTorch: W1 (in, hidden), W2 (hidden, out)."""
    k1, k2, k3, k4 = jax.random.split(key, 4)
    lim1 = 1.0 / jnp.sqrt(in_features)
    lim2 = 1.0 / jnp.sqrt(hidden_features)
    w1 = jax.random.uniform(k1, (in_features, hidden_features), dtype, -lim1, lim1)
    b1 = jax.random.uniform(k2, (hidden_features,), dtype, -lim1, lim1)
    w2 = jax.random.uniform(k3, (hidden_features, out_features), dtype, -lim2, lim2)
    b2 = jax.random.uniform(k4, (out_features,), dtype, -lim2, lim2)
    return w1, b1, w2, b2


if __name__ == "__main__":
    key = jax.random.PRNGKey(0)
    kx, kp, kx2, kp2 = jax.random.split(key, 4)

    # Case 1: deliberately "awkward" small shapes: odd token count (exercises
    # row padding + 2 row tiles) and non-128 feature dims (feature padding),
    # hidden = 4 * dim like the ViT Block (mlp_ratio=4).
    B, N = 2, 13
    D_in, H, D_out = 48, 192, 48
    x = jax.random.normal(kx, (B, N, D_in), dtype=jnp.float32)
    w1, b1, w2, b2 = init_mlp_params(kp, D_in, H, D_out)
    ref = jax.nn.gelu(x @ w1 + b1, approximate=False) @ w2 + b2

    out = jax.block_until_ready(mlp_forward(x, w1, b1, w2, b2))
    assert out.shape == (B, N, D_out)
    assert jnp.allclose(out, ref, atol=1e-5, rtol=1e-5), float(
        jnp.max(jnp.abs(out - ref)))

    # Same shapes but force the multi-chunk in-kernel hidden loop.
    out_c = jax.block_until_ready(
        mlp_forward(x, w1, b1, w2, b2, hidden_chunk=128))
    assert jnp.allclose(out_c, ref, atol=1e-5, rtol=1e-5), float(
        jnp.max(jnp.abs(out_c - ref)))

    # Case 2: fully aligned shapes (exercises the zero-pad-skip fast path).
    B2, N2 = 2, 16
    D2, H2, O2 = 128, 256, 256
    x2 = jax.random.normal(kx2, (B2, N2, D2), dtype=jnp.float32)
    w1b, b1b, w2b, b2b = init_mlp_params(kp2, D2, H2, O2)
    ref2 = jax.nn.gelu(x2 @ w1b + b1b, approximate=False) @ w2b + b2b
    out2 = jax.block_until_ready(mlp_forward(x2, w1b, b1b, w2b, b2b))
    assert jnp.allclose(out2, ref2, atol=1e-5, rtol=1e-5), float(
        jnp.max(jnp.abs(out2 - ref2)))

    # Case 3: bf16 operands (what v5e/v6e/v7x MXU throughput wants) with f32
    # accumulation; compared against the f32 reference with loose tolerance.
    xb = x.astype(jnp.bfloat16)
    outb = jax.block_until_ready(
        mlp_forward(xb, w1.astype(jnp.bfloat16), b1.astype(jnp.bfloat16),
                    w2.astype(jnp.bfloat16), b2.astype(jnp.bfloat16)))
    assert outb.shape == (B, N, D_out)
    assert jnp.allclose(outb.astype(jnp.float32), ref, atol=0.1, rtol=0.1)

    print("KERNEL_OK")
</pallas_src>

<mosaic_0001>
module attributes {stable_mosaic.version = 11 : i64} {
  func.func @_mlp_kernel(%arg0: i32, %arg1: memref<16x128xf32, #tpu.memory_space<vmem>>, %arg2: memref<128x256xf32, #tpu.memory_space<vmem>>, %arg3: memref<1x256xf32, #tpu.memory_space<vmem>>, %arg4: memref<256x256xf32, #tpu.memory_space<vmem>>, %arg5: memref<1x256xf32, #tpu.memory_space<vmem>>, %arg6: memref<16x256xf32, #tpu.memory_space<vmem>>) attributes {dimension_semantics = [#tpu.dimension_semantics<parallel>], iteration_bounds = array<i64: 2>, scalar_prefetch = 0 : i64, scratch_operands = 0 : i64, tpu.core_type = #tpu.core_type<tc>, window_params = [{transform_indices = @transform_0, window_bounds = array<i64: 16, 128>}, {pipeline_mode = #tpu.pipeline_mode<synchronous>, transform_indices = @transform_1, window_bounds = array<i64: 128, 256>}, {pipeline_mode = #tpu.pipeline_mode<synchronous>, transform_indices = @transform_2, window_bounds = array<i64: 1, 256>}, {pipeline_mode = #tpu.pipeline_mode<synchronous>, transform_indices = @transform_3, window_bounds = array<i64: 256, 256>}, {pipeline_mode = #tpu.pipeline_mode<synchronous>, transform_indices = @transform_4, window_bounds = array<i64: 1, 256>}, {transform_indices = @transform_5, window_bounds = array<i64: 16, 256>}]} {
    %c0 = arith.constant 0 : index
    %c0_0 = arith.constant 0 : index
    %0 = vector.load %arg1[%c0, %c0_0] : memref<16x128xf32, #tpu.memory_space<vmem>>, vector<16x128xf32>
    %c0_1 = arith.constant 0 : index
    %c0_2 = arith.constant 0 : index
    %1 = vector.load %arg2[%c0_1, %c0_2] : memref<128x256xf32, #tpu.memory_space<vmem>>, vector<128x256xf32>
    %cst = arith.constant dense<0.000000e+00> : vector<16x256xf32>
    %2 = tpu.matmul %0, %1, %cst {dimension_numbers = #tpu.dot_dimension_numbers<[1], [0], [0], [1], [0, 0, 1, 1], [], []>} : vector<16x128xf32>, vector<128x256xf32>, vector<16x256xf32> -> vector<16x256xf32>
    %c0_3 = arith.constant 0 : index
    %c0_4 = arith.constant 0 : index
    %3 = vector.load %arg3[%c0_3, %c0_4] : memref<1x256xf32, #tpu.memory_space<vmem>>, vector<1x256xf32>
    %4 = vector.broadcast %3 : vector<1x256xf32> to vector<16x256xf32>
    %5 = arith.addf %2, %4 : vector<16x256xf32>
    %cst_5 = arith.constant 5.000000e-01 : f32
    %6 = vector.broadcast %cst_5 : f32 to vector<16x256xf32>
    %7 = arith.mulf %6, %5 : vector<16x256xf32>
    %cst_6 = arith.constant 0.707106769 : f32
    %8 = vector.broadcast %cst_6 : f32 to vector<16x256xf32>
    %9 = arith.mulf %5, %8 : vector<16x256xf32>
    %10 = math.erf %9 : vector<16x256xf32>
    %cst_7 = arith.constant 1.000000e+00 : f32
    %11 = vector.broadcast %cst_7 : f32 to vector<16x256xf32>
    %12 = arith.addf %11, %10 : vector<16x256xf32>
    %13 = arith.mulf %7, %12 : vector<16x256xf32>
    %c0_8 = arith.constant 0 : index
    %c0_9 = arith.constant 0 : index
    %14 = vector.load %arg4[%c0_8, %c0_9] : memref<256x256xf32, #tpu.memory_space<vmem>>, vector<256x256xf32>
    %cst_10 = arith.constant dense<0.000000e+00> : vector<16x256xf32>
    %15 = tpu.matmul %13, %14, %cst_10 {dimension_numbers = #tpu.dot_dimension_numbers<[1], [0], [0], [1], [0, 0, 1, 1], [], []>} : vector<16x256xf32>, vector<256x256xf32>, vector<16x256xf32> -> vector<16x256xf32>
    %c0_11 = arith.constant 0 : index
    %c0_12 = arith.constant 0 : index
    %16 = vector.load %arg5[%c0_11, %c0_12] : memref<1x256xf32, #tpu.memory_space<vmem>>, vector<1x256xf32>
    %17 = vector.broadcast %16 : vector<1x256xf32> to vector<16x256xf32>
    %18 = arith.addf %15, %17 : vector<16x256xf32>
    %c0_13 = arith.constant 0 : index
    %c0_14 = arith.constant 0 : index
    %19 = vector.load %arg6[%c0_13, %c0_14] : memref<16x256xf32, #tpu.memory_space<vmem>>, vector<16x256xf32>
    tpu.vector_store %arg6[%c0_13, %c0_14], %18 {strides = array<i32>} : memref<16x256xf32, #tpu.memory_space<vmem>>, vector<16x256xf32>,
    return
  }
  func.func @transform_0(%arg0: i32) -> (i32, i32) {
    %c0_i32 = arith.constant 0 : i32
    %c0_i32_0 = arith.constant 0 : i32
    return %arg0, %c0_i32 : i32, i32
  }
  func.func @transform_1(%arg0: i32) -> (i32, i32) {
    %c0_i32 = arith.constant 0 : i32
    %c0_i32_0 = arith.constant 0 : i32
    %c0_i32_1 = arith.constant 0 : i32
    return %c0_i32, %c0_i32_0 : i32, i32
  }
  func.func @transform_2(%arg0: i32) -> (i32, i32) {
    %c0_i32 = arith.constant 0 : i32
    %c0_i32_0 = arith.constant 0 : i32
    %c0_i32_1 = arith.constant 0 : i32
    return %c0_i32, %c0_i32_0 : i32, i32
  }
  func.func @transform_3(%arg0: i32) -> (i32, i32) {
    %c0_i32 = arith.constant 0 : i32
    %c0_i32_0 = arith.constant 0 : i32
    %c0_i32_1 = arith.constant 0 : i32
    return %c0_i32, %c0_i32_0 : i32, i32
  }
  func.func @transform_4(%arg0: i32) -> (i32, i32) {
    %c0_i32 = arith.constant 0 : i32
    %c0_i32_0 = arith.constant 0 : i32
    %c0_i32_1 = arith.constant 0 : i32
    return %c0_i32, %c0_i32_0 : i32, i32
  }
  func.func @transform_5(%arg0: i32) -> (i32, i32) {
    %c0_i32 = arith.constant 0 : i32
    %c0_i32_0 = arith.constant 0 : i32
    return %arg0, %c0_i32 : i32, i32
  }
}

</mosaic_0001>

<bundles_post_ra>
// kernel: tpu_custom_call.1
= control target key start
LH: loop header
LB: loop body
LE: loop exit
PB: predicated region body
PF: predicated region fallthrough
CT: control target
= control target key end

     0   :  { %10 = vsyncpa [#allocation3], 0  ;;  %s1327_s0 = inlined_call_operand.hbm [shape: f32[32,128], index: 0, kind: input, shape index: {}]   ;;  %s1328_s1 = inlined_call_operand.hbm [shape: f32[128,256], index: 1, kind: input, shape index: {}]   ;;  %s1329_s2 = inlined_call_operand.vmem [shape: f32[1,256], index: 2, kind: input, shape index: {}]   ;;  %s1330_s3 = inlined_call_operand.hbm [shape: f32[256,256], index: 3, kind: input, shape index: {}]   ;;  %s1331_s4 = inlined_call_operand.vmem [shape: f32[1,256], index: 4, kind: input, shape index: {}]   ;;  %s1332_s5 = inlined_call_operand.hbm [shape: f32[32,256], index: 5, kind: output, shape index: {}]  }
   0x1   :  { %12 = vsyncpa [#allocation3 + $0x1], 0 }
   0x2   :  { %13 = vsyncpa [#allocation6], 0 }
   0x3   :  { %14 = vsyncpa [#allocation4], 0 }
   0x4   :  { %16 = vsyncpa [#allocation4 + $0x1], 0  ;;  %s1080_s18 = smov 0   ;;  %s1082_s19 = smov 0  }
   0x5   :  { %s1084_s20 = smov 0   ;;  %s1086_s21 = smov 0  }
   0x6 LB: > { %s1101_s22 = sadd.s32 4294967295, %s1037_s21   ;;  %s681_s23 = sadd.s32 4294967294, %s1037_s21   ;;  %s1037_s21 = sphi %s1086_s21, %s1352_s21   ;;  %s1033_s20 = sphi %s1084_s20, %s1351_s20   ;;  %s1029_s19 = sphi %s1082_s19, %s1350_s19   ;;  %s1025_s18 = sphi %s1080_s18, %s1349_s18  }
   0x7   : > { %p42_p0 = scmp.ne.s32.totalorder %s1029_s19, %s1025_s18  ;;  %p1333_p1 = scmp.eq.s32.totalorder %s1101_s22, 0 }
   0x8   : > { %p156_p3 = scmp.eq.s32.totalorder %s681_s23, 1  ;;  %p682_p5 = scmp.ge.s32.totalorder %s1037_s21, 1 }
   0x9   : > { %p1110_p4 = por %p1333_p1, %p42_p0  ;;  %p163_p7 = scmp.lt.s32.totalorder %s1037_s21, 3 }
   0xa   : > { %p1115_p6 = por %p156_p3, %p42_p0  ;;  %s1039_s27 = smov [#allocation5]  }
   0xb   : > { %s1336_s24 = scalar_select %p1110_p4, 1, 0 }
   0xc   : > { %s1337_s25 = scalar_select %p1115_p6, 1, 0 }
   0xd   : > { %p1120_p8 = pnand %p682_p5, %p163_p7  ;;  %s175_s28 = sshll.u32 %s1039_s27, 4  ;;  %s1124_s28 = int_to_ptr.vmem [resolvable:$true] %s175_s28 }
   0xe   : > { %s1040_s30 = smov [#allocation7]   ;;  %s881_s9 = scalar_lea.hbm %s1328_s1, 4096 }
   0xf   : > { %p811_p9 = pneg %p1120_p8  ;;  %s191_s6 = sshll.u32 %s1040_s30, 4  ;;  %s1135_s6 = int_to_ptr.vmem [resolvable:$true] %s191_s6 }
  0x10   : > { %p882_p12 = scmp.ne.s32.totalorder %s1328_s1, %s881_s9  ;;  %p888_p5 = scmp.lt.u32.totalorder %s881_s9, %s1328_s1 }
  0x11   : > { %p1131_p11 = pnand %p811_p9, %p1333_p1 }
  0x13   : > { %p883_p13 = pneg %p1131_p11 }
  0x15   : > { %p884_p0 = pnand %p883_p13, %p882_p12 }
  0x17   : > { %p885_p3 = pneg %p884_p0 }
  0x19   : > { %p890_p7 = pnand %p888_p5, %p885_p3 }
  0x1b   : > { %893 = shalt.err (!%p890_p7)
}
  0x1c   : > { %s894_s14 = scalar_lea.vmem %s1124_s28, 4096  ;;  %p902_p2 = scmp.lt.s32.totalorder %s1124_s28, %s1124_s28 }
  0x1d   : > { %p895_p9 = scmp.ne.s32.totalorder %s1124_s28, %s894_s14  ;;  %p903_p12 = scmp.lt.s32.totalorder %s894_s14, %s894_s14 }
  0x1f   : > { %p897_p10 = pnand %p895_p9, %p883_p13  ;;  %p904_p0 = por %p903_p12, %p902_p2 }
  0x21   : > { %p898_p1 = pneg %p897_p10 }
  0x23   : > { %p905_p6 = pnand %p904_p0, %p898_p1 }
  0x25   : > { %908 = shalt.err (!%p905_p6)
}
  0x26   : > { %s1041_s15 = smov 256   ;;  %s1042_s16 = smov 16  }
  0x27   : > { %814 = dma.hbm_to_vmem [thread:$0]  (!%p1131_p11), %s1328_s1, 4096, %s1124_s28, [#allocation6], %s1041_s15, %s1041_s15, %s1042_s16  }
  0x28   : > { %s909_s7 = scalar_lea.hbm %s1330_s3, 8192 }
  0x29   : > { %p910_p2 = scmp.ne.s32.totalorder %s1330_s3, %s909_s7  ;;  %p916_p10 = scmp.lt.u32.totalorder %s909_s7, %s1330_s3 }
  0x2b   : > { %p912_p1 = pnand %p910_p2, %p883_p13 }
  0x2d   : > { %p913_p6 = pneg %p912_p1 }
  0x2f   : > { %p918_p3 = pnand %p916_p10, %p913_p6 }
  0x31   : > { %921 = shalt.err (!%p918_p3)
}
  0x32   : > { %s922_s28 = scalar_lea.vmem %s1135_s6, 8192  ;;  %p930_p12 = scmp.lt.s32.totalorder %s1135_s6, %s1135_s6 }
  0x33   : > { %p923_p5 = scmp.ne.s32.totalorder %s1135_s6, %s922_s28  ;;  %p931_p0 = scmp.lt.s32.totalorder %s922_s28, %s922_s28 }
  0x35   : > { %p925_p7 = pnand %p923_p5, %p883_p13  ;;  %p932_p2 = por %p931_p0, %p930_p12 }
  0x37   : > { %p926_p9 = pneg %p925_p7 }
  0x39   : > { %p933_p1 = pnand %p932_p2, %p926_p9 }
  0x3b   : > { %936 = shalt.err (!%p933_p1)
}
  0x3c   : > { %817 = dma.hbm_to_vmem [thread:$0]  (!%p1131_p11), %s1330_s3, 8192, %s1135_s6, [#allocation6], %s1041_s15, %s1041_s15, %s1042_s16  }
  0x3d   : > { %s1190_s14 = sadd.s32 1, %s1037_s21   ;;  %s29_s29 = sadd.s32 1, %s1033_s20 }
  0x3e   : > { %s26_s17 = ssub.s32 %s1037_s21, %s1190_s14  ;;  %p36_p13 = scmp.ne.s32.totalorder %s1033_s20, %s1029_s19 }
  0x3f   : > { %p27_p6 = scmp.eq.s32.totalorder %s26_s17, 0  ;;  %p37_p10 = scmp.eq.s32.totalorder %s1037_s21, 0 }
  0x40   : > { %p1340_p3 = scmp.eq.s32.totalorder %s1101_s22, 1  ;;  %p828_p7 = scmp.lt.s32.totalorder %s1037_s21, 2 }
  0x41   : > { %s1206_s27 = scalar_select %p27_p6, %s1033_s20, %s29_s29  }
  0x42   : > { %p1200_p5 = por %p1340_p3, %p36_p13  ;;  %p38_p9 = por %p37_p10, %p36_p13 }
  0x43   : > { %s208_s30 = sand.u32 1, %s1033_s20   ;;  %s700_s6 = sshll.u32 %s1037_s21, 8 }
  0x44   : > { %s1341_s23 = scalar_select %p1200_p5, 1, 0 }
  0x45   : > { %s686_s7 = sshll.u32 %s208_s30, 4  ;;  %s1213_s8 = scalar_lea.hbm %s1327_s0, %s700_s6 }
  0x46   : > { %s212_s9 = scalar_lea.vmem [#allocation2], %s686_s7  ;;  %p1217_p11 = pnand %p828_p7, %p38_p9 }
  0x47   : > { %s219_s10 = sshll.u32 %s212_s9, 4  ;;  %s1221_s28 = scalar_lea.sflag [#allocation3], %s208_s30  ;;  %s1215_s10 = int_to_ptr.vmem [resolvable:$true] %s219_s10 }
  0x48   : > { %s937_s12 = scalar_lea.hbm %s1213_s8, 256  ;;  %p939_p0 = pneg %p1217_p11 }
  0x49   : > { %p938_p12 = scmp.ne.s32.totalorder %s1213_s8, %s937_s12  ;;  %s942_s17 = scalar_lea.hbm %s1327_s0, 512 }
  0x4a   : > { %p943_p13 = scmp.lt.u32.totalorder %s1213_s8, %s1327_s0  ;;  %p944_p6 = scmp.lt.u32.totalorder %s942_s17, %s937_s12 }
  0x4b   : > { %p940_p2 = pnand %p939_p0, %p938_p12  ;;  %p946_p3 = scmp.lt.u32.totalorder %s937_s12, %s1213_s8 }
  0x4c   : > { %p945_p10 = por %p944_p6, %p943_p13 }
  0x4d   : > { %p941_p1 = pneg %p940_p2 }
  0x4e   : > { %p947_p7 = por %p946_p3, %p945_p10 }
  0x50   : > { %p948_p9 = pnand %p947_p7, %p941_p1 }
  0x52   : > { %951 = shalt.err (!%p948_p9)
}
  0x53   : > { %s952_s30 = scalar_lea.vmem %s1215_s10, 256  ;;  %s1043_s15 = smov [#allocation2]  }
  0x54   : > { %p953_p12 = scmp.ne.s32.totalorder %s1215_s10, %s952_s30  ;;  %s957_s16 = sshll.u32 %s1043_s15, 4  ;;  %s958_s16 = int_to_ptr.vmem [resolvable:$false] %s957_s16 }
  0x55   : > { %s959_s9 = scalar_lea.vmem %s958_s16, 512  ;;  %p960_p4 = scmp.lt.s32.totalorder %s1215_s10, %s958_s16 }
  0x56   : > { %p955_p2 = pnand %p953_p12, %p939_p0  ;;  %p961_p13 = scmp.lt.s32.totalorder %s959_s9, %s952_s30 }
  0x58   : > { %p956_p5 = pneg %p955_p2  ;;  %p962_p6 = por %p961_p13, %p960_p4 }
  0x5a   : > { %p963_p10 = pnand %p962_p6, %p956_p5 }
  0x5c   : > { %966 = shalt.err (!%p963_p10)
}
  0x5d   : > { %s1044_s12 = smov 128   ;;  %s1045_s13 = smov 8  }
  0x5e   : > { %821 = dma.hbm_to_vmem [thread:$0]  (!%p1217_p11), %s1213_s8, 256, %s1215_s10, %s1221_s28, %s1044_s12, %s1044_s12, %s1045_s13  }
  0x5f   : > { %231 = sbr.rel (%p1120_p8) target bundleno = 608 (0x260), region = 40  ;;  %s1252_s29 = sand.u32 (!%p1120_p8), 1, %s1029_s19  }
  0x60   : > { %s690_s17 = sshll.u32 (!%p1120_p8), %s1252_s29, 4  ;;  %s234_s7 = scalar_lea.sflag (!%p1120_p8), [#allocation3], %s1252_s29 }
  0x61   : > { %s1256_s6 = scalar_lea.vmem (!%p1120_p8), [#allocation2], %s690_s17  ;;  %p1343_p4 = scmp.ne.s32.totalorder (!%p1120_p8), %s1336_s24, 0 }
  0x66   : > { %1012 = dma.done.wait (%p1343_p4), %s234_s7, 256  }
  0x67   : > { %1014 = vsyncadd (%p1343_p4), %s234_s7, 4294967040  ;;  %p1344_p5 = scmp.eq.s32.totalorder %s1101_s22, 0 }
  0x69   : > { %1016 = dma.done.wait (%p1344_p5), [#allocation6], 12288   ;;  %p1345_p8 = pmov %p1344_p5 }
  0x6a   : > { %v1046_v0 = vmov 0.0   ;;  %v277_v1 = vld [vmem:[#allocation5 + $0x8] sm:$0xff]  ;;  %v279_v2 = vld [vmem:[#allocation5 + $0x18] sm:$0xff]  ;;  %v276_v3 = vld [vmem:[#allocation5] sm:$0xff]  ;;  %s693_s11 = sshll.u32 %s1252_s29, 5  ;;  %s702_s15 = sshll.u32 %s1101_s22, 9 }
  0x6b   : > { %1018 = vsyncadd (%p1345_p8), [#allocation6], 4294955008  ;;  %384 = vmatprep.mubr.f32.mxu0 %v1046_v0  ;;  %v703_v4 = vpack.c.bf16 %v279_v2, %v277_v1  ;;  %v278_v5 = vld [vmem:[#allocation5 + $0x10] sm:$0xff]  ;;  %v281_v6 = vld [vmem:[#allocation5 + $0x28] sm:$0xff]  ;;  %s271_s28 = scalar_lea.vmem [#allocation8], %s693_s11  ;;  %s1283_s12 = scalar_lea.hbm %s1332_s5, %s702_s15 }
  0x6c   : > { %v283_v7 = vld [vmem:[#allocation5 + $0x38] sm:$0xff]  ;;  %v705_v8 = vpack.c.bf16 %v278_v5, %v276_v3  ;;  %v280_v10 = vld [vmem:[#allocation5 + $0x20] sm:$0xff]  ;;  %v282_v11 = vld [vmem:[#allocation5 + $0x30] sm:$0xff]  ;;  %s589_s30 = sshll.u32 %s271_s28, 4  ;;  %s575_s13 = scalar_lea.sflag [#allocation4], %s1252_s29  ;;  %s1278_s30 = int_to_ptr.vmem [resolvable:$true] %s589_s30 }
  0x6d   : > { %v707_v9 = vpack.c.bf16 %v283_v7, %v281_v6  ;;  %v285_v12 = vld [vmem:[#allocation5 + $0x48] sm:$0xff]  ;;  %704 = vmatprep.subr.bf16.mxu0 %v703_v4  ;;  %v287_v13 = vld [vmem:[#allocation5 + $0x58] sm:$0xff]  ;;  %v709_v14 = vpack.c.bf16 %v282_v11, %v280_v10  ;;  %v284_v16 = vld [vmem:[#allocation5 + $0x40] sm:$0xff]  ;;  %s967_s22 = scalar_lea.vmem %s1278_s30, 512  ;;  %p1346_p0 = scmp.ne.s32.totalorder %s1341_s23, 0 }
  0x6e   : > { %706 = vmatpush1.bf16.msra.mxu0 %v705_v8  ;;  %v711_v15 = vpack.c.bf16 %v287_v13, %v285_v12  ;;  %v286_v17 = vld [vmem:[#allocation5 + $0x50] sm:$0xff]  ;;  %v289_v18 = vld [vmem:[#allocation5 + $0x68] sm:$0xff]  ;;  %v291_v19 = vld [vmem:[#allocation5 + $0x78] sm:$0xff]  ;;  %p968_p11 = scmp.ne.s32.totalorder %s1278_s30, %s967_s22  ;;  %s1047_s17 = smov [#allocation8]  }
  0x6f   : > { %708 = vmatprep.subr.bf16.mxu0 %v707_v9  ;;  %v713_v20 = vpack.c.bf16 %v286_v17, %v284_v16  ;;  %v715_v21 = vpack.c.bf16 %v291_v19, %v289_v18  ;;  %v288_v22 = vld [vmem:[#allocation5 + $0x60] sm:$0xff]  ;;  %v290_v23 = vld [vmem:[#allocation5 + $0x70] sm:$0xff]  ;;  %v293_v24 = vld [vmem:[#allocation5 + $0x88] sm:$0xff]  ;;  %s971_s7 = sshll.u32 %s1047_s17, 4  ;;  %s972_s7 = int_to_ptr.vmem [resolvable:$false] %s971_s7 }
  0x70   : > { %v295_v25 = vld [vmem:[#allocation5 + $0x98] sm:$0xff]  ;;  %v292_v26 = vld [vmem:[#allocation5 + $0x80] sm:$0xff]  ;;  %v294_v27 = vld [vmem:[#allocation5 + $0x90] sm:$0xff]  ;;  %v717_v30 = vpack.c.bf16 %v290_v23, %v288_v22  ;;  %p969_p1 = pnand %p968_p11, %p1346_p0  ;;  %p974_p7 = scmp.lt.s32.totalorder %s1278_s30, %s972_s7 }
  0x71   : > { %v418_v28 = vld [vmem:[#allocation7 + $0x8] sm:$0xff]  ;;  %v420_v29 = vld [vmem:[#allocation7 + $0x18] sm:$0xff]  ;;  %v417_v33 = vld [vmem:[#allocation7] sm:$0xff]  ;;  %v719_v36 = vpack.c.bf16 %v295_v25, %v293_v24  ;;  %v721_v46 = vpack.c.bf16 %v294_v27, %v292_v26 }
  0x72   : > { %710 = vmatpush1.bf16.msra.mxu0 %v709_v14  ;;  %v297_v31 = vld [vmem:[#allocation5 + $0xa8] sm:$0xff]  ;;  %v735_v32 = vpack.c.bf16 %v420_v29, %v418_v28  ;;  %v419_v34 = vld [vmem:[#allocation7 + $0x10] sm:$0xff]  ;;  %v424_v38 = vld [vmem:[#allocation7 + $0x38] sm:$0xff]  ;;  %p970_p3 = pneg %p969_p1 }
  0x73   : > { %712 = vmatprep.subr.bf16.mxu0 %v711_v15  ;;  %v422_v35 = vld [vmem:[#allocation7 + $0x28] sm:$0xff]  ;;  %v737_v37 = vpack.c.bf16 %v419_v34, %v417_v33  ;;  %v421_v39 = vld [vmem:[#allocation7 + $0x20] sm:$0xff]  ;;  %v423_v40 = vld [vmem:[#allocation7 + $0x30] sm:$0xff] }
  0x74   : > { %v299_v41 = vld [vmem:[#allocation5 + $0xb8] sm:$0xff]  ;;  %736 = vmatprep.subr.bf16.mxu1 %v735_v32  ;;  %v739_v42 = vpack.c.bf16 %v424_v38, %v422_v35  ;;  %v426_v43 = vld [vmem:[#allocation7 + $0x48] sm:$0xff]  ;;  %v741_v45 = vpack.c.bf16 %v423_v40, %v421_v39  ;;  %v296_v47 = vld [vmem:[#allocation5 + $0xa0] sm:$0xff] }
  0x75   : > { %v428_v44 = vld [vmem:[#allocation7 + $0x58] sm:$0xff]  ;;  %738 = vmatpush1.bf16.msra.mxu1 %v737_v37  ;;  %v425_v49 = vld [vmem:[#allocation7 + $0x40] sm:$0xff]  ;;  %v427_v50 = vld [vmem:[#allocation7 + $0x50] sm:$0xff]  ;;  %v723_v51 = vpack.c.bf16 %v299_v41, %v297_v31 }
  0x76   : > { %714 = vmatpush1.bf16.msra.mxu0 %v713_v20  ;;  %740 = vmatprep.subr.bf16.mxu1 %v739_v42  ;;  %v743_v48 = vpack.c.bf16 %v428_v44, %v426_v43  ;;  %v298_v52 = vld [vmem:[#allocation5 + $0xb0] sm:$0xff]  ;;  %v430_v53 = vld [vmem:[#allocation7 + $0x68] sm:$0xff]  ;;  %v432_v54 = vld [vmem:[#allocation7 + $0x78] sm:$0xff]  ;;  %v745_v57 = vpack.c.bf16 %v427_v50, %v425_v49 }
  0x77   : > { %716 = vmatprep.subr.bf16.mxu0 %v715_v21  ;;  %v301_v55 = vld [vmem:[#allocation5 + $0xc8] sm:$0xff]  ;;  %v303_v56 = vld [vmem:[#allocation5 + $0xd8] sm:$0xff]  ;;  %v725_v58 = vpack.c.bf16 %v298_v52, %v296_v47  ;;  %v300_v59 = vld [vmem:[#allocation5 + $0xc0] sm:$0xff]  ;;  %v747_v60 = vpack.c.bf16 %v432_v54, %v430_v53 }
  0x78   : > { %v429_v61 = vld [vmem:[#allocation7 + $0x60] sm:$0xff]  ;;  %v431_v62 = vld [vmem:[#allocation7 + $0x70] sm:$0xff]  ;;  %v727_v63 = vpack.c.bf16 %v303_v56, %v301_v55  ;;  %v434_v2 = vld [vmem:[#allocation7 + $0x88] sm:$0xff] }
  0x79   : > { %742 = vmatpush1.bf16.msra.mxu1 %v741_v45  ;;  %v302_v1 = vld [vmem:[#allocation5 + $0xd0] sm:$0xff]  ;;  %v436_v3 = vld [vmem:[#allocation7 + $0x98] sm:$0xff]  ;;  %v305_v4 = vld [vmem:[#allocation5 + $0xe8] sm:$0xff]  ;;  %v749_v6 = vpack.c.bf16 %v431_v62, %v429_v61 }
  0x7a   : > { %718 = vmatpush1.bf16.msra.mxu0 %v717_v30  ;;  %744 = vmatprep.subr.bf16.mxu1 %v743_v48  ;;  %v307_v5 = vld [vmem:[#allocation5 + $0xf8] sm:$0xff]  ;;  %v729_v7 = vpack.c.bf16 %v302_v1, %v300_v59  ;;  %v304_v8 = vld [vmem:[#allocation5 + $0xe0] sm:$0xff]  ;;  %v751_v9 = vpack.c.bf16 %v436_v3, %v434_v2  ;;  %v435_v11 = vld [vmem:[#allocation7 + $0x90] sm:$0xff] }
  0x7b   : > { %720 = vmatprep.subr.bf16.mxu0 %v719_v36  ;;  %v433_v10 = vld [vmem:[#allocation7 + $0x80] sm:$0xff]  ;;  %v731_v12 = vpack.c.bf16 %v307_v5, %v305_v4  ;;  %v306_v13 = vld [vmem:[#allocation5 + $0xf0] sm:$0xff]  ;;  %v438_v14 = vld [vmem:[#allocation7 + $0xa8] sm:$0xff] }
  0x7c   : > { %v440_v15 = vld [vmem:[#allocation7 + $0xb8] sm:$0xff]  ;;  %v753_v16 = vpack.c.bf16 %v435_v11, %v433_v10  ;;  %v733_v17 = vpack.c.bf16 %v306_v13, %v304_v8  ;;  %v437_v19 = vld [vmem:[#allocation7 + $0xa0] sm:$0xff]  ;;  %v439_v20 = vld [vmem:[#allocation7 + $0xb0] sm:$0xff] }
  0x7d   : > { %746 = vmatpush1.bf16.msra.mxu1 %v745_v57  ;;  %v755_v18 = vpack.c.bf16 %v440_v15, %v438_v14  ;;  %v442_v21 = vld [vmem:[#allocation7 + $0xc8] sm:$0xff]  ;;  %v444_v22 = vld [vmem:[#allocation7 + $0xd8] sm:$0xff]  ;;  %v757_v23 = vpack.c.bf16 %v439_v20, %v437_v19  ;;  %v274_v24 = vld [vmem:[%s1256_s6] sm:$0xff]  ;;  %v310_v20 = vlaneseq }
  0x7e   : > { %722 = vmatpush1.bf16.msra.mxu0 %v721_v46  ;;  %748 = vmatprep.subr.bf16.mxu1 %v747_v60  ;;  %v759_v25 = vpack.c.bf16 %v444_v22, %v442_v21  ;;  %v441_v26 = vld [vmem:[#allocation7 + $0xc0] sm:$0xff]  ;;  %v443_v27 = vld [vmem:[#allocation7 + $0xd0] sm:$0xff]  ;;  %v446_v28 = vld [vmem:[#allocation7 + $0xe8] sm:$0xff] }
  0x7f   : > { %724 = vmatprep.subr.bf16.mxu0 %v723_v51  ;;  %v448_v29 = vld [vmem:[#allocation7 + $0xf8] sm:$0xff]  ;;  %v761_v30 = vpack.c.bf16 %v443_v27, %v441_v26  ;;  %v445_v33 = vld [vmem:[#allocation7 + $0xe0] sm:$0xff]  ;;  %v447_v34 = vld [vmem:[#allocation7 + $0xf0] sm:$0xff]  ;;  %v311_v21 = vshrl.u32 %v310_v20, 7 }
  0x80   : > { %v275_v31 = vld [vmem:[%s1256_s6 + $0x8] sm:$0xff]  ;;  %v763_v32 = vpack.c.bf16 %v448_v29, %v446_v28  ;;  %v765_v37 = vpack.c.bf16 %v447_v34, %v445_v33  ;;  %v449_v39 = vld [vmem:[#allocation7 + $0x100] sm:$0xff]  ;;  %v451_v40 = vld [vmem:[#allocation7 + $0x110] sm:$0xff]  ;;  %s973_s6 = scalar_lea.vmem %s972_s7, 1024 }
  0x81   : > { %750 = vmatpush1.bf16.msra.mxu1 %v749_v6  ;;  %v450_v35 = vld [vmem:[#allocation7 + $0x108] sm:$0xff]  ;;  %v452_v36 = vld [vmem:[#allocation7 + $0x118] sm:$0xff]  ;;  %v769_v43 = vpack.c.bf16 %v451_v40, %v449_v39  ;;  %v453_v44 = vld [vmem:[#allocation7 + $0x120] sm:$0xff]  ;;  %v312_v22 = vsub.s32 0, %v311_v21  ;;  %p975_p9 = scmp.lt.s32.totalorder %s973_s6, %s967_s22 }
  0x82   : > { %726 = vmatpush1.bf16.msra.mxu0 %v725_v58  ;;  %752 = vmatprep.subr.bf16.mxu1 %v751_v9  ;;  %v767_v38 = vpack.c.bf16 %v452_v36, %v450_v35  ;;  %v454_v41 = vld [vmem:[#allocation7 + $0x128] sm:$0xff]  ;;  %v456_v42 = vld [vmem:[#allocation7 + $0x138] sm:$0xff]  ;;  %v455_v45 = vld [vmem:[#allocation7 + $0x130] sm:$0xff] }
  0x83   : > { %728 = vmatprep.subr.bf16.mxu0 %v727_v63  ;;  %v458_v46 = vld [vmem:[#allocation7 + $0x148] sm:$0xff]  ;;  %v460_v47 = vld [vmem:[#allocation7 + $0x158] sm:$0xff]  ;;  %v773_v48 = vpack.c.bf16 %v455_v45, %v453_v44  ;;  %v457_v50 = vld [vmem:[#allocation7 + $0x140] sm:$0xff]  ;;  %p976_p12 = por %p975_p9, %p974_p7 }
  0x84   : > { %v775_v49 = vpack.c.bf16 %v460_v47, %v458_v46  ;;  %v459_v51 = vld [vmem:[#allocation7 + $0x150] sm:$0xff]  ;;  %v462_v53 = vld [vmem:[#allocation7 + $0x168] sm:$0xff]  ;;  %v464_v54 = vld [vmem:[#allocation7 + $0x178] sm:$0xff] }
  0x85   : > { %754 = vmatpush1.bf16.msra.mxu1 %v753_v16  ;;  %v777_v52 = vpack.c.bf16 %v459_v51, %v457_v50  ;;  %v779_v55 = vpack.c.bf16 %v464_v54, %v462_v53  ;;  %v461_v56 = vld [vmem:[#allocation7 + $0x160] sm:$0xff]  ;;  %v463_v57 = vld [vmem:[#allocation7 + $0x170] sm:$0xff]  ;;  %v466_v59 = vld [vmem:[#allocation7 + $0x188] sm:$0xff]  ;;  %p977_p2 = pnand %p976_p12, %p970_p3 }
  0x86   : > { %730 = vmatpush1.bf16.msra.mxu0 %v729_v7  ;;  %756 = vmatprep.subr.bf16.mxu1 %v755_v18  ;;  %v781_v58 = vpack.c.bf16 %v463_v57, %v461_v56  ;;  %v468_v60 = vld [vmem:[#allocation7 + $0x198] sm:$0xff]  ;;  %v465_v62 = vld [vmem:[#allocation7 + $0x180] sm:$0xff]  ;;  %v467_v63 = vld [vmem:[#allocation7 + $0x190] sm:$0xff] }
  0x87   : > { %732 = vmatprep.subr.bf16.mxu0 %v731_v12  ;;  %v783_v61 = vpack.c.bf16 %v468_v60, %v466_v59  ;;  %v785_v1 = vpack.c.bf16 %v467_v63, %v465_v62  ;;  %v470_v2 = vld [vmem:[#allocation7 + $0x1a8] sm:$0xff]  ;;  %v472_v3 = vld [vmem:[#allocation7 + $0x1b8] sm:$0xff]  ;;  %v469_v5 = vld [vmem:[#allocation7 + $0x1a0] sm:$0xff] }
  0x88   : > { %v787_v4 = vpack.c.bf16 %v472_v3, %v470_v2  ;;  %v471_v6 = vld [vmem:[#allocation7 + $0x1b0] sm:$0xff]  ;;  %v474_v8 = vld [vmem:[#allocation7 + $0x1c8] sm:$0xff]  ;;  %v476_v9 = vld [vmem:[#allocation7 + $0x1d8] sm:$0xff] }
  0x89   : > { %758 = vmatpush1.bf16.msra.mxu1 %v757_v23  ;;  %v789_v7 = vpack.c.bf16 %v471_v6, %v469_v5  ;;  %v791_v10 = vpack.c.bf16 %v476_v9, %v474_v8  ;;  %v473_v11 = vld [vmem:[#allocation7 + $0x1c0] sm:$0xff]  ;;  %v475_v12 = vld [vmem:[#allocation7 + $0x1d0] sm:$0xff]  ;;  %v478_v14 = vld [vmem:[#allocation7 + $0x1e8] sm:$0xff] }
  0x8a   : > { %734 = vmatpush1.bf16.msra.mxu0 %v733_v17  ;;  %760 = vmatprep.subr.bf16.mxu1 %v759_v25  ;;  %v793_v13 = vpack.c.bf16 %v475_v12, %v473_v11  ;;  %v480_v15 = vld [vmem:[#allocation7 + $0x1f8] sm:$0xff]  ;;  %v477_v17 = vld [vmem:[#allocation7 + $0x1e0] sm:$0xff]  ;;  %v479_v18 = vld [vmem:[#allocation7 + $0x1f0] sm:$0xff] }
  0x8b   : > { %v795_v16 = vpack.c.bf16 %v480_v15, %v478_v14  ;;  %v797_v19 = vpack.c.bf16 %v479_v18, %v477_v17  ;;  %v308_v23 = vld [vmem:[%s1329_s2] sm:$0x3] }
  0x8c   : > { %v313_v25 = vrot.slane %v308_v23, %v312_v22  ;;  %v481_v54 = vld [vmem:[%s1331_s4] sm:$0x3] }
  0x8d   : > { %385 = vmatmul.mubr.f32.vlgmr.msra.gmra.mrb[0].mxu0 %v274_v24  ;;  %762 = vmatpush1.bf16.msra.mxu1 %v761_v30  ;;  %v316_v24 = vsub.s32 1, %v311_v21 }
  0x8e   : > { %390 = vmatprep.mubr.f32.mxu0 %v1046_v0  ;;  %764 = vmatprep.subr.bf16.mxu1 %v763_v32  ;;  %v771_v0 = vpack.c.bf16 %v456_v42, %v454_v41 }
  0x8f   : > { %v317_v26 = vrot.slane %v308_v23, %v316_v24  ;;  %v490_v56 = vrot.slane %v481_v54, %v316_v24 }
  0x91   : > { %391 = vmatmul.mubr.f32.gmra.mrb[2].mxu0 %v275_v31  ;;  %766 = vmatpush1.bf16.msra.mxu1 %v765_v37 }
  0x92   : > { %768 = vmatprep.subr.bf16.mxu1 %v767_v38 }
  0x95   : > { %770 = vmatpush1.bf16.msra.mxu1 %v769_v43 }
  0x96   : > { %772 = vmatprep.subr.bf16.mxu1 %v771_v0 }
  0x99   : > { %774 = vmatpush1.bf16.msra.mxu1 %v773_v48 }
  0x9a   : > { %776 = vmatprep.subr.bf16.mxu1 %v775_v49 }
  0x9d   : > { %778 = vmatpush1.bf16.msra.mxu1 %v777_v52 }
  0x9e   : > { %780 = vmatprep.subr.bf16.mxu1 %v779_v55  ;;  %v486_v55 = vrot.slane %v481_v54, %v312_v22 }
  0xa1   : > { %782 = vmatpush1.bf16.msra.mxu1 %v781_v58 }
  0xa2   : > { %784 = vmatprep.subr.bf16.mxu1 %v783_v61 }
  0xa5   : > { %786 = vmatpush1.bf16.msra.mxu1 %v785_v1 }
  0xa6   : > { %788 = vmatprep.subr.bf16.mxu1 %v787_v4 }
  0xa9   : > { %790 = vmatpush1.bf16.msra.mxu1 %v789_v7 }
  0xaa   : > { %792 = vmatprep.subr.bf16.mxu1 %v791_v10 }
  0xad   : > { %794 = vmatpush1.bf16.msra.mxu1 %v793_v13 }
  0xae   : > { %796 = vmatprep.subr.bf16.mxu1 %v795_v16 }
  0xb1   : > { %798 = vmatpush1.bf16.msra.mxu1 %v797_v19 }
 0x160   : > { %v386_v27 = vpop.f32.mrb[0].mxu0 }
 0x161   : > { %v387_v28 = vadd.f32 %v386_v27, %v313_v25  ;;  %v388_v29 = vpop.f32.mrb[1].mxu0 }
 0x162   : > { %v389_v30 = vadd.f32 %v388_v29, %v317_v26 }
 0x163   : > { %v401_v31 = vmul.f32 0.70710677, %v387_v28  ;;  %v397_v0 = vmul.f32 0.5, %v387_v28 }
 0x164   : > { %v402_v32 = vmul.f32 0.70710677, %v389_v30  ;;  %v392_v33 = vpop.f32.mrb[2].mxu0  ;;  %v398_v42 = vmul.f32 0.5, %v389_v30 }
 0x165   : > { %873 = verf.f32 %v401_v31  ;;  %v393_v34 = vadd.f32 %v392_v33, %v313_v25  ;;  %v394_v35 = vpop.f32.mrb[3].mxu0 }
 0x166   : > { %875 = verf.f32 %v402_v32  ;;  %v395_v36 = vadd.f32 %v394_v35, %v317_v26 }
 0x167   : > { %v403_v37 = vmul.f32 0.70710677, %v393_v34  ;;  %v399_v51 = vmul.f32 0.5, %v393_v34 }
 0x168   : > { %v404_v38 = vmul.f32 0.70710677, %v395_v36  ;;  %v400_v49 = vmul.f32 0.5, %v395_v36 }
 0x169   : > { %877 = verf.f32 %v403_v37 }
 0x16a   : > { %879 = verf.f32 %v404_v38 }
 0x16f   : > { %v874_v39 = vpop.eup %873 }
 0x170   : > { %v876_v40 = vpop.eup %875  ;;  %v409_v41 = vadd.f32 1.0, %v874_v39 }
 0x171   : > { %v410_v43 = vadd.f32 1.0, %v876_v40 }
 0x172   : > { %v413_v48 = vmul.f32 %v409_v41, %v397_v0 }
 0x173   : > { %v878_v44 = vpop.eup %877  ;;  %v414_v45 = vmul.f32 %v410_v43, %v398_v42 }
 0x174   : > { %v880_v46 = vpop.eup %879  ;;  %v411_v47 = vadd.f32 1.0, %v878_v44 }
 0x175   : > { %v412_v50 = vadd.f32 1.0, %v880_v46  ;;  %557 = vmatprep.mubr.f32.mxu1 %v414_v45 }
 0x176   : > { %558 = vmatmul.mubr.f32.vlgmr.msra.gmra.mrb[0].mxu1 %v413_v48  ;;  %v415_v53 = vmul.f32 %v411_v47, %v399_v51 }
 0x177   : > { %v416_v52 = vmul.f32 %v412_v50, %v400_v49 }
 0x179   : > { %563 = vmatprep.mubr.f32.mxu1 %v416_v52 }
 0x17a   : > { %564 = vmatmul.mubr.f32.gmra.mrb[2].mxu1 %v415_v53 }
 0x249   : > { %v559_v57 = vpop.f32.mrb[0].mxu1 }
 0x24a   : > { %v560_v58 = vadd.f32 %v559_v57, %v486_v55  ;;  %v561_v59 = vpop.f32.mrb[1].mxu1 }
 0x24b   : > { %v562_v60 = vadd.f32 %v561_v59, %v490_v56 }
 0x24c   : > { %570 = vst [vmem:[%s271_s28] sm:$0xff] %v560_v58 }
 0x24d   : > { %571 = vst [vmem:[%s271_s28 + $0x8] sm:$0xff] %v562_v60  ;;  %v565_v61 = vpop.f32.mrb[2].mxu1 }
 0x24e   : > { %v566_v62 = vadd.f32 %v565_v61, %v486_v55  ;;  %v567_v63 = vpop.f32.mrb[3].mxu1 }
 0x24f   : > { %v568_v1 = vadd.f32 %v567_v63, %v490_v56 }
 0x250   : > { %572 = vst [vmem:[%s271_s28 + $0x10] sm:$0xff] %v566_v62 }
 0x251   : > { %573 = vst [vmem:[%s271_s28 + $0x18] sm:$0xff] %v568_v1 }
 0x252   : > { %980 = shalt.err (!%p977_p2)
}
 0x253   : > { %s981_s24 = scalar_lea.hbm %s1283_s12, 512  ;;  %s985_s10 = scalar_lea.hbm %s1332_s5, 1024 }
 0x254   : > { %p982_p13 = scmp.ne.s32.totalorder %s1283_s12, %s981_s24  ;;  %p986_p4 = scmp.lt.u32.totalorder %s1283_s12, %s1332_s5 }
 0x255   : > { %p987_p5 = scmp.lt.u32.totalorder %s985_s10, %s981_s24  ;;  %p989_p11 = scmp.lt.u32.totalorder %s981_s24, %s1283_s12 }
 0x256   : > { %p983_p6 = pnand %p982_p13, %p1346_p0 }
 0x257   : > { %p988_p8 = por %p987_p5, %p986_p4 }
 0x258   : > { %p984_p10 = pneg %p983_p6 }
 0x259   : > { %p990_p1 = por %p989_p11, %p988_p8 }
 0x25b   : > { %p991_p3 = pnand %p990_p1, %p984_p10 }
 0x25d   : > { %994 = shalt.err (!%p991_p3)
}
 0x25e   : > { %s1048_s15 = smov 256   ;;  %s1049_s16 = smov 16  }
 0x25f   : > { %809 = dma.vmem_to_hbm [thread:$0]  (%p1346_p0), %s1278_s30, 512, %s1283_s12, %s575_s13, %s1048_s15, %s1048_s15, %s1049_s16  }
 0x260 PF: > { %s604_s9 = sand.u32 1, %s1025_s18   ;;  %p1347_p7 = scmp.ne.s32.totalorder %s1337_s25, 0 }
 0x261   : > { %p1348_p9 = scmp.ge.s32.totalorder %s1037_s21, 2  ;;  %s605_s22 = scalar_lea.sflag [#allocation4], %s604_s9 }
 0x263   : > { %p823_p12 = pnand %p1348_p9, %p1347_p7 }
 0x265   : > { %1020 = dma.done.wait (!%p823_p12), %s605_s22, 512  }
 0x266   : > { %1022 = vsyncadd (!%p823_p12), %s605_s22, 4294966784  ;;  %p19_p2 = scmp.ge.s32.totalorder %s1190_s14, 4   ;;  %s1349_s18 = smov %s1029_s19 }
 0x267   : > { %s1350_s19 = smov %s1033_s20  ;;  %s1351_s20 = smov %s1206_s27 }
 0x268   : > { %s1352_s21 = smov %s1190_s14  ;;  %21 = sbr.rel (!%p19_p2) target bundleno = 6 (0x6), region = 93 }
 0x26f   :  { %610 = vsyncpa [#allocation3], 1 }
 0x270   :  { %612 = vsyncpa [#allocation3 + $0x1], 1 }
 0x271   :  { %613 = vsyncpa [#allocation6], 1 }
 0x272   :  { %614 = vsyncpa [#allocation4], 1 }
 0x273   :  { %616 = vsyncpa [#allocation4 + $0x1], 1 }

</bundles_post_ra>
